<compile_context>
chip_gen: v6e
topology: v6e:2x2x1
jax: 0.10.0
libtpu: 0.0.40
codegen_flags: <defaults>
</compile_context>

<pallas_src>
import functools

import jax
import jax.numpy as jnp
from jax import lax
from jax.experimental import pallas as pl
from jax.experimental.pallas import tpu as pltpu

HIDDEN = 256
LANE = 128


def _round_up(x, m):
    return ((x + m - 1) // m) * m


def actor_fwd_kernel(x_ref, w1_ref, b1_ref, w2_ref, b2_ref, wh_ref, bh_ref,
                     out_ref, *, act_dim):
    """One batch tile. x/weights bf16, biases f32, f32 MXU accumulation.

    Output slab lane layout: [0:act_dim) = mean, [act_dim:2*act_dim) = std,
    remaining lanes = padding (sliced off in the wrapper).
    """
    # fc layer 1: Linear + ReLU (MXU bf16 matmul, f32 accumulate).
    h1 = jnp.dot(x_ref[...], w1_ref[...],
                 preferred_element_type=jnp.float32) + b1_ref[...]
    h1 = jnp.maximum(h1, 0.0)

    # fc layer 2: Linear + ReLU.
    h2 = jnp.dot(h1.astype(jnp.bfloat16), w2_ref[...],
                 preferred_element_type=jnp.float32) + b2_ref[...]
    h2 = jnp.maximum(h2, 0.0)

    # Fused heads: one lane-dense matmul producing [mean | log_std | pad].
    heads = jnp.dot(h2.astype(jnp.bfloat16), wh_ref[...],
                    preferred_element_type=jnp.float32) + bh_ref[...]

    # std = exp(clamp(log_std, -5, 2)) on std/pad lanes; mean lanes pass through.
    std = jnp.exp(jnp.clip(heads, -5.0, 2.0))
    lane = lax.broadcasted_iota(jnp.int32, heads.shape, dimension=1)
    out_ref[...] = jnp.where(lane >= act_dim, std, heads).astype(out_ref.dtype)


def prepare_actor_params(params):
    """One-time (per parameter update) prep: bf16 casts + fused head packing."""
    act_dim = params["wm"].shape[1]
    head_pad = _round_up(max(2 * act_dim, LANE), LANE)

    wh = jnp.zeros((HIDDEN, head_pad), jnp.bfloat16)
    wh = wh.at[:, :act_dim].set(params["wm"].astype(jnp.bfloat16))
    wh = wh.at[:, act_dim:2 * act_dim].set(params["ws"].astype(jnp.bfloat16))
    bh = jnp.zeros((1, head_pad), jnp.float32)
    bh = bh.at[:, :act_dim].set(params["bm"].reshape(1, -1))
    bh = bh.at[:, act_dim:2 * act_dim].set(params["bs"].reshape(1, -1))

    return dict(
        w1=params["w1"].astype(jnp.bfloat16),
        b1=params["b1"].reshape(1, -1).astype(jnp.float32),
        w2=params["w2"].astype(jnp.bfloat16),
        b2=params["b2"].reshape(1, -1).astype(jnp.float32),
        wh=wh, bh=bh)


@functools.partial(jax.jit, static_argnames=("act_dim", "tile_b"))
def actor_forward(x, prepped, *, act_dim, tile_b=1024):
    """x: (B, obs_dim) f32; prepped: output of prepare_actor_params()."""
    B, obs_dim = x.shape
    head_pad = prepped["wh"].shape[1]

    # Batch tiling: multiples of 16 (bf16 vreg packing), as big as the batch
    # allows, but split into >=2 grid steps when possible so the "parallel"
    # batch axis shards across v7x's two TensorCores.
    tile_b = max(16, min(tile_b, _round_up(B, 16)))
    if _round_up(B, 16) >= 2 * 256:
        tile_b = min(tile_b, _round_up((B + 1) // 2, 256))
    b_pad = _round_up(B, tile_b)
    grid = (b_pad // tile_b,)

    # Only batch-pad + cast; obs_dim is NOT lane-padded (block last dim equals
    # the full array dim, which is legal) so input DMA stays minimal.
    x_p = jnp.pad(x, ((0, b_pad - B), (0, 0))).astype(jnp.bfloat16)

    w1, b1 = prepped["w1"], prepped["b1"]
    w2, b2 = prepped["w2"], prepped["b2"]
    wh, bh = prepped["wh"], prepped["bh"]

    flops = 2 * b_pad * (obs_dim * HIDDEN + HIDDEN * HIDDEN + HIDDEN * head_pad)
    bytes_accessed = (
        b_pad * obs_dim * 2                        # bf16 activations in
        + (w1.size + w2.size + wh.size) * 2        # bf16 weights (resident)
        + (b1.size + b2.size + bh.size) * 4        # f32 biases
        + b_pad * head_pad * 2)                    # bf16 output slab
    cost = pl.CostEstimate(flops=flops, transcendentals=b_pad * head_pad,
                           bytes_accessed=bytes_accessed)

    kernel = functools.partial(actor_fwd_kernel, act_dim=act_dim)

    def resident(shape):
        # Same block index every step -> DMA'd once, stays resident in VMEM.
        return pl.BlockSpec(shape, lambda i: (0, 0))

    out = pl.pallas_call(
        kernel,
        out_shape=jax.ShapeDtypeStruct((b_pad, head_pad), jnp.bfloat16),
        grid=grid,
        in_specs=[
            pl.BlockSpec((tile_b, obs_dim), lambda i: (i, 0)),  # x tile
            resident((obs_dim, HIDDEN)),                        # w1
            resident((1, HIDDEN)),                              # b1
            resident((HIDDEN, HIDDEN)),                         # w2
            resident((1, HIDDEN)),                              # b2
            resident((HIDDEN, head_pad)),                       # fused head weights
            resident((1, head_pad)),                            # fused head biases
        ],
        out_specs=pl.BlockSpec((tile_b, head_pad), lambda i: (i, 0)),
        compiler_params=pltpu.CompilerParams(
            dimension_semantics=("parallel",)),                 # megacore on v7x
        cost_estimate=cost,
    )(x_p, w1, b1, w2, b2, wh, bh)

    mean = out[:B, :act_dim].astype(jnp.float32)
    std = out[:B, act_dim:2 * act_dim].astype(jnp.float32)
    return mean, std


def init_actor_params(key, obs_dim, act_dim):
    """Deterministic synthetic init (shapes match the Actor's nn.Linear layers)."""
    ks = jax.random.split(key, 8)

    def lin(kw, kb, fan_in, fan_out):
        bound = 1.0 / jnp.sqrt(fan_in)
        w = jax.random.uniform(kw, (fan_in, fan_out), jnp.float32, -bound, bound)
        b = jax.random.uniform(kb, (1, fan_out), jnp.float32, -bound, bound)
        return w, b

    w1, b1 = lin(ks[0], ks[1], obs_dim, HIDDEN)
    w2, b2 = lin(ks[2], ks[3], HIDDEN, HIDDEN)
    wm, bm = lin(ks[4], ks[5], HIDDEN, act_dim)
    ws, bs = lin(ks[6], ks[7], HIDDEN, act_dim)
    return dict(w1=w1, b1=b1, w2=w2, b2=b2, wm=wm, bm=bm, ws=ws, bs=bs)


def actor_forward_ref(x, p, *, bf16_matmul=False):
    """Pure-JAX reference of the PyTorch forward (optionally bf16-matched matmuls)."""
    if bf16_matmul:
        cast = lambda a: a.astype(jnp.bfloat16).astype(jnp.float32)
    else:
        cast = lambda a: a
    dot = lambda a, b: jnp.dot(cast(a), cast(b), precision="highest",
                               preferred_element_type=jnp.float32)
    h = jnp.maximum(dot(x, p["w1"]) + p["b1"], 0.0)
    h = jnp.maximum(dot(h, p["w2"]) + p["b2"], 0.0)
    mean = dot(h, p["wm"]) + p["bm"]
    log_std = jnp.clip(dot(h, p["ws"]) + p["bs"], -5.0, 2.0)
    return mean, jnp.exp(log_std)


# TODO(synk): Actor.sample() (tanh-squashed Normal rsample + log_prob correction) is a
# host/JAX-level RNG/distribution op and is intentionally not translated into the kernel.

if __name__ == "__main__":
    key = jax.random.PRNGKey(0)
    k_param, k_x, k_x2 = jax.random.split(key, 3)

    batch, obs_dim, act_dim = 8, 16, 8
    params = init_actor_params(k_param, obs_dim, act_dim)
    prepped = prepare_actor_params(params)

    # --- small batch (single grid step) ---
    x = jax.random.normal(k_x, (batch, obs_dim), jnp.float32)
    mean, std = actor_forward(x, prepped, act_dim=act_dim)
    jax.block_until_ready((mean, std))
    assert mean.shape == (batch, act_dim) and std.shape == (batch, act_dim)

    # Matched-precision reference (bf16 matmuls; kernel additionally stores bf16).
    mean_bf, std_bf = actor_forward_ref(x, params, bf16_matmul=True)
    assert jnp.allclose(mean, mean_bf, atol=2e-2, rtol=2e-2)
    assert jnp.allclose(std, std_bf, atol=2e-2, rtol=2e-2)

    # Loose check against the full-f32 PyTorch-equivalent reference.
    mean_ref, std_ref = actor_forward_ref(x, params, bf16_matmul=False)
    assert jnp.allclose(mean, mean_ref, atol=6e-2, rtol=6e-2)
    assert jnp.allclose(std, std_ref, atol=6e-2, rtol=6e-2)
    assert bool(jnp.all(std > 0))

    # --- larger batch: exercises batch padding, multi-step grid & megacore split ---
    big_b = 1000
    x_big = jax.random.normal(k_x2, (big_b, obs_dim), jnp.float32)
    mean_b, std_b = actor_forward(x_big, prepped, act_dim=act_dim)
    jax.block_until_ready((mean_b, std_b))
    assert mean_b.shape == (big_b, act_dim) and std_b.shape == (big_b, act_dim)
    mean_b_ref, std_b_ref = actor_forward_ref(x_big, params, bf16_matmul=True)
    assert jnp.allclose(mean_b, mean_b_ref, atol=2e-2, rtol=2e-2)
    assert jnp.allclose(std_b, std_b_ref, atol=2e-2, rtol=2e-2)
    assert bool(jnp.all(std_b > 0))

    print("KERNEL_OK")
</pallas_src>

<mosaic_0001>
module attributes {stable_mosaic.version = 11 : i64} {
  func.func @actor_fwd_kernel(%arg0: i32, %arg1: memref<16x16xbf16, #tpu.memory_space<vmem>>, %arg2: memref<16x256xbf16, #tpu.memory_space<vmem>>, %arg3: memref<1x256xf32, #tpu.memory_space<vmem>>, %arg4: memref<256x256xbf16, #tpu.memory_space<vmem>>, %arg5: memref<1x256xf32, #tpu.memory_space<vmem>>, %arg6: memref<256x128xbf16, #tpu.memory_space<vmem>>, %arg7: memref<1x128xf32, #tpu.memory_space<vmem>>, %arg8: memref<16x128xbf16, #tpu.memory_space<vmem>>) attributes {dimension_semantics = [#tpu.dimension_semantics<parallel>], iteration_bounds = array<i64: 1>, scalar_prefetch = 0 : i64, scratch_operands = 0 : i64, tpu.core_type = #tpu.core_type<tc>, window_params = [{transform_indices = @transform_0, window_bounds = array<i64: 16, 16>}, {pipeline_mode = #tpu.pipeline_mode<synchronous>, transform_indices = @transform_1, window_bounds = array<i64: 16, 256>}, {pipeline_mode = #tpu.pipeline_mode<synchronous>, transform_indices = @transform_2, window_bounds = array<i64: 1, 256>}, {pipeline_mode = #tpu.pipeline_mode<synchronous>, transform_indices = @transform_3, window_bounds = array<i64: 256, 256>}, {pipeline_mode = #tpu.pipeline_mode<synchronous>, transform_indices = @transform_4, window_bounds = array<i64: 1, 256>}, {pipeline_mode = #tpu.pipeline_mode<synchronous>, transform_indices = @transform_5, window_bounds = array<i64: 256, 128>}, {pipeline_mode = #tpu.pipeline_mode<synchronous>, transform_indices = @transform_6, window_bounds = array<i64: 1, 128>}, {transform_indices = @transform_7, window_bounds = array<i64: 16, 128>}]} {
    %c0 = arith.constant 0 : index
    %c0_0 = arith.constant 0 : index
    %0 = vector.load %arg1[%c0, %c0_0] : memref<16x16xbf16, #tpu.memory_space<vmem>>, vector<16x16xbf16>
    %c0_1 = arith.constant 0 : index
    %c0_2 = arith.constant 0 : index
    %1 = vector.load %arg2[%c0_1, %c0_2] : memref<16x256xbf16, #tpu.memory_space<vmem>>, vector<16x256xbf16>
    %cst = arith.constant dense<0.000000e+00> : vector<16x256xf32>
    %2 = tpu.matmul %0, %1, %cst {dimension_numbers = #tpu.dot_dimension_numbers<[1], [0], [0], [1], [0, 0, 1, 1], [], []>} : vector<16x16xbf16>, vector<16x256xbf16>, vector<16x256xf32> -> vector<16x256xf32>
    %c0_3 = arith.constant 0 : index
    %c0_4 = arith.constant 0 : index
    %3 = vector.load %arg3[%c0_3, %c0_4] : memref<1x256xf32, #tpu.memory_space<vmem>>, vector<1x256xf32>
    %4 = vector.broadcast %3 : vector<1x256xf32> to vector<16x256xf32>
    %5 = arith.addf %2, %4 : vector<16x256xf32>
    %cst_5 = arith.constant 0.000000e+00 : f32
    %6 = vector.broadcast %cst_5 : f32 to vector<16x256xf32>
    %7 = arith.maximumf %5, %6 : vector<16x256xf32>
    %8 = arith.truncf %7 : vector<16x256xf32> to vector<16x256xbf16>
    %c0_6 = arith.constant 0 : index
    %c0_7 = arith.constant 0 : index
    %9 = vector.load %arg4[%c0_6, %c0_7] : memref<256x256xbf16, #tpu.memory_space<vmem>>, vector<256x256xbf16>
    %cst_8 = arith.constant dense<0.000000e+00> : vector<16x256xf32>
    %10 = tpu.matmul %8, %9, %cst_8 {dimension_numbers = #tpu.dot_dimension_numbers<[1], [0], [0], [1], [0, 0, 1, 1], [], []>} : vector<16x256xbf16>, vector<256x256xbf16>, vector<16x256xf32> -> vector<16x256xf32>
    %c0_9 = arith.constant 0 : index
    %c0_10 = arith.constant 0 : index
    %11 = vector.load %arg5[%c0_9, %c0_10] : memref<1x256xf32, #tpu.memory_space<vmem>>, vector<1x256xf32>
    %12 = vector.broadcast %11 : vector<1x256xf32> to vector<16x256xf32>
    %13 = arith.addf %10, %12 : vector<16x256xf32>
    %cst_11 = arith.constant 0.000000e+00 : f32
    %14 = vector.broadcast %cst_11 : f32 to vector<16x256xf32>
    %15 = arith.maximumf %13, %14 : vector<16x256xf32>
    %16 = arith.truncf %15 : vector<16x256xf32> to vector<16x256xbf16>
    %c0_12 = arith.constant 0 : index
    %c0_13 = arith.constant 0 : index
    %17 = vector.load %arg6[%c0_12, %c0_13] : memref<256x128xbf16, #tpu.memory_space<vmem>>, vector<256x128xbf16>
    %cst_14 = arith.constant dense<0.000000e+00> : vector<16x128xf32>
    %18 = tpu.matmul %16, %17, %cst_14 {dimension_numbers = #tpu.dot_dimension_numbers<[1], [0], [0], [1], [0, 0, 1, 1], [], []>} : vector<16x256xbf16>, vector<256x128xbf16>, vector<16x128xf32> -> vector<16x128xf32>
    %c0_15 = arith.constant 0 : index
    %c0_16 = arith.constant 0 : index
    %19 = vector.load %arg7[%c0_15, %c0_16] : memref<1x128xf32, #tpu.memory_space<vmem>>, vector<1x128xf32>
    %20 = vector.broadcast %19 : vector<1x128xf32> to vector<16x128xf32>
    %21 = arith.addf %18, %20 : vector<16x128xf32>
    %cst_17 = arith.constant -5.000000e+00 : f32
    %cst_18 = arith.constant 2.000000e+00 : f32
    %22 = vector.broadcast %cst_17 : f32 to vector<16x128xf32>
    %23 = arith.maximumf %22, %21 : vector<16x128xf32>
    %24 = vector.broadcast %cst_18 : f32 to vector<16x128xf32>
    %25 = arith.minimumf %24, %23 : vector<16x128xf32>
    %26 = math.exp %25 : vector<16x128xf32>
    %27 = tpu.iota {dimensions = array<i32: 1>} : vector<16x128xi32>
    %c8_i32 = arith.constant 8 : i32
    %28 = vector.broadcast %c8_i32 : i32 to vector<16x128xi32>
    %29 = arith.cmpi sge, %27, %28 : vector<16x128xi32>
    %30 = arith.select %29, %26, %21 : vector<16x128xi1>, vector<16x128xf32>
    %31 = arith.truncf %30 : vector<16x128xf32> to vector<16x128xbf16>
    %c0_19 = arith.constant 0 : index
    %c0_20 = arith.constant 0 : index
    %32 = vector.load %arg8[%c0_19, %c0_20] : memref<16x128xbf16, #tpu.memory_space<vmem>>, vector<16x128xbf16>
    tpu.vector_store %arg8[%c0_19, %c0_20], %31 {strides = array<i32>} : memref<16x128xbf16, #tpu.memory_space<vmem>>, vector<16x128xbf16>,
    return
  }
  func.func @transform_0(%arg0: i32) -> (i32, i32) {
    %c0_i32 = arith.constant 0 : i32
    %c0_i32_0 = arith.constant 0 : i32
    return %arg0, %c0_i32 : i32, i32
  }
  func.func @transform_1(%arg0: i32) -> (i32, i32) {
    %c0_i32 = arith.constant 0 : i32
    %c0_i32_0 = arith.constant 0 : i32
    %c0_i32_1 = arith.constant 0 : i32
    return %c0_i32, %c0_i32_0 : i32, i32
  }
  func.func @transform_2(%arg0: i32) -> (i32, i32) {
    %c0_i32 = arith.constant 0 : i32
    %c0_i32_0 = arith.constant 0 : i32
    %c0_i32_1 = arith.constant 0 : i32
    return %c0_i32, %c0_i32_0 : i32, i32
  }
  func.func @transform_3(%arg0: i32) -> (i32, i32) {
    %c0_i32 = arith.constant 0 : i32
    %c0_i32_0 = arith.constant 0 : i32
    %c0_i32_1 = arith.constant 0 : i32
    return %c0_i32, %c0_i32_0 : i32, i32
  }
  func.func @transform_4(%arg0: i32) -> (i32, i32) {
    %c0_i32 = arith.constant 0 : i32
    %c0_i32_0 = arith.constant 0 : i32
    %c0_i32_1 = arith.constant 0 : i32
    return %c0_i32, %c0_i32_0 : i32, i32
  }
  func.func @transform_5(%arg0: i32) -> (i32, i32) {
    %c0_i32 = arith.constant 0 : i32
    %c0_i32_0 = arith.constant 0 : i32
    %c0_i32_1 = arith.constant 0 : i32
    return %c0_i32, %c0_i32_0 : i32, i32
  }
  func.func @transform_6(%arg0: i32) -> (i32, i32) {
    %c0_i32 = arith.constant 0 : i32
    %c0_i32_0 = arith.constant 0 : i32
    %c0_i32_1 = arith.constant 0 : i32
    return %c0_i32, %c0_i32_0 : i32, i32
  }
  func.func @transform_7(%arg0: i32) -> (i32, i32) {
    %c0_i32 = arith.constant 0 : i32
    %c0_i32_0 = arith.constant 0 : i32
    return %arg0, %c0_i32 : i32, i32
  }
}

</mosaic_0001>

<bundles_post_ra>
// kernel: actor_forward.1
= control target key start
LH: loop header
LB: loop body
LE: loop exit
PB: predicated region body
PF: predicated region fallthrough
CT: control target
= control target key end

     0   :  { %12 = vsyncpa [#allocation3], 0  ;;  %s880_s0 = inlined_call_operand.vmem [shape: bf16[16,16], index: 0, kind: input, shape index: {}]   ;;  %s881_s1 = inlined_call_operand.vmem [shape: bf16[16,256], index: 1, kind: input, shape index: {}]   ;;  %s882_s2 = inlined_call_operand.vmem [shape: f32[1,256], index: 2, kind: input, shape index: {}]   ;;  %s883_s3 = inlined_call_operand.hbm [shape: bf16[256,256], index: 3, kind: input, shape index: {}]   ;;  %s884_s4 = inlined_call_operand.vmem [shape: f32[1,256], index: 4, kind: input, shape index: {}]   ;;  %s885_s5 = inlined_call_operand.hbm [shape: bf16[256,128], index: 5, kind: input, shape index: {}]   ;;  %s886_s6 = inlined_call_operand.vmem [shape: f32[1,128], index: 6, kind: input, shape index: {}]   ;;  %s887_s7 = inlined_call_operand.vmem [shape: bf16[16,128], index: 7, kind: output, shape index: {}]  }
   0x1   :  { %13 = vsyncpa [#allocation5], 0  ;;  %s804_s24 = smov [#allocation2]  }
   0x2   :  { %s25_s25 = sshll.u32 %s804_s24, 4  ;;  %s26_s25 = int_to_ptr.vmem [resolvable:$true] %s25_s25 }
   0x3   :  { %s768_s26 = scalar_lea.vmem %s26_s25, 4096  ;;  %p773_p1 = scmp.lt.s32.totalorder %s26_s25, %s26_s25 }
   0x4   :  { %p769_p0 = scmp.ne.s32.totalorder %s26_s25, %s768_s26  ;;  %p774_p2 = scmp.lt.s32.totalorder %s768_s26, %s768_s26 }
   0x6   :  { %p775_p3 = por %p774_p2, %p773_p1 }
   0x8   :  { %p776_p4 = pnand %p775_p3, %p769_p0 }
   0xa   :  { %779 = shalt.err (!%p776_p4)
}
   0xb   :  { %s805_s27 = smov 128   ;;  %s806_s28 = smov 8  }
   0xc   :  { %31 = dma.hbm_to_vmem [thread:$0]  %s883_s3, 4096, %s26_s25, [#allocation3], %s805_s27, %s805_s27, %s806_s28  }
   0xd   :  { %s807_s8 = smov [#allocation4]  }
   0xe   :  { %s39_s9 = sshll.u32 %s807_s8, 4  ;;  %s40_s9 = int_to_ptr.vmem [resolvable:$true] %s39_s9 }
   0xf   :  { %s788_s10 = scalar_lea.vmem %s40_s9, 2048  ;;  %p793_p6 = scmp.lt.s32.totalorder %s40_s9, %s40_s9 }
  0x10   :  { %p789_p5 = scmp.ne.s32.totalorder %s40_s9, %s788_s10  ;;  %p794_p7 = scmp.lt.s32.totalorder %s788_s10, %s788_s10 }
  0x12   :  { %p795_p8 = por %p794_p7, %p793_p6 }
  0x14   :  { %p796_p9 = pnand %p795_p8, %p789_p5 }
  0x16   :  { %799 = shalt.err (!%p796_p9)
}
  0x17   :  { %s808_s11 = smov 64   ;;  %s809_s12 = smov 4  }
  0x18   :  { %45 = dma.hbm_to_vmem [thread:$0]  %s885_s5, 2048, %s40_s9, [#allocation5], %s808_s11, %s808_s11, %s809_s12  }
  0x19   :  { %800 = dma.done.wait [#allocation3], 4096  }
  0x1a   :  { %801 = vsyncadd [#allocation3], 4294963200 }
  0x1b   :  { %802 = dma.done.wait [#allocation5], 2048  }
  0x1c   :  { %803 = vsyncadd [#allocation5], 4294965248  ;;  %v810_v0 = vmov 0   ;;  %v688_v1 = vld [vmem:[%s881_s1 + $0x4] ss:$8 sps:$4 sm:$0xff]   ;;  %vm86_vm0 = vcmask 130048   ;;  %v61_v46 = vlaneseq }
  0x1d   :  { %122 = vmatprep.mubr.bf16.mxu0 %v810_v0  ;;  %v690_v2 = vld [vmem:[%s881_s1] ss:$8 sps:$4 sm:$0xff]   ;;  %104 = vmatprep.subr.bf16.mxu0 %v688_v1  ;;  %v692_v4 = vld [vmem:[#allocation2 + $0x74] ss:$8 sps:$4 sm:$0xff]   ;;  %v694_v5 = vld [vmem:[#allocation2 + $0x70] ss:$8 sps:$4 sm:$0xff]  }
  0x1e   :  { %v691_v3 = vld [vmem:[%s880_s0] sm:$0xff]   ;;  %105 = vmatpush1.bf16.msra.mxu0 %v690_v2  ;;  %343 = vmatprep.subr.bf16.mxu1 %v692_v4  ;;  %v698_v8 = vld [vmem:[#allocation2 + $0x54] ss:$8 sps:$4 sm:$0xff]   ;;  %v700_v9 = vld [vmem:[#allocation2 + $0x50] ss:$8 sps:$4 sm:$0xff]   ;;  %v62_v47 = vshrl.u32 %v61_v46, 7 }
  0x1f   :  { %v695_v6 = vld [vmem:[#allocation2 + $0x64] ss:$8 sps:$4 sm:$0xff]   ;;  %344 = vmatpush1.bf16.msra.mxu1 %v694_v5  ;;  %v697_v7 = vld [vmem:[#allocation2 + $0x60] ss:$8 sps:$4 sm:$0xff]   ;;  %v704_v12 = vld [vmem:[#allocation2 + $0x34] ss:$8 sps:$4 sm:$0xff]  }
  0x20   :  { %345 = vmatprep.subr.bf16.mxu1 %v695_v6  ;;  %v701_v10 = vld [vmem:[#allocation2 + $0x44] ss:$8 sps:$4 sm:$0xff]   ;;  %v703_v11 = vld [vmem:[#allocation2 + $0x40] ss:$8 sps:$4 sm:$0xff]   ;;  %v706_v13 = vld [vmem:[#allocation2 + $0x30] ss:$8 sps:$4 sm:$0xff]  }
  0x21   :  { %600 = vmatmul.mubr.msk.bf16.vlgmr.msra.gmra.mxu0 %vm86_vm0, %v691_v3  ;;  %v707_v14 = vld [vmem:[#allocation2 + $0x24] ss:$8 sps:$4 sm:$0xff]   ;;  %v709_v15 = vld [vmem:[#allocation2 + $0x20] ss:$8 sps:$4 sm:$0xff]   ;;  %v710_v16 = vld [vmem:[#allocation2 + $0x14] ss:$8 sps:$4 sm:$0xff]  }
  0x22   :  { %v712_v17 = vld [vmem:[#allocation2 + $0x10] ss:$8 sps:$4 sm:$0xff]   ;;  %v713_v18 = vld [vmem:[#allocation2 + $0x4] ss:$8 sps:$4 sm:$0xff]   ;;  %v715_v19 = vld [vmem:[#allocation2] ss:$8 sps:$4 sm:$0xff]  }
  0x23   :  { %346 = vmatpush1.bf16.msra.mxu1 %v697_v7  ;;  %v716_v20 = vld [vmem:[#allocation2 + $0xf4] ss:$8 sps:$4 sm:$0xff]   ;;  %v718_v21 = vld [vmem:[#allocation2 + $0xf0] ss:$8 sps:$4 sm:$0xff]   ;;  %v719_v22 = vld [vmem:[#allocation2 + $0xe4] ss:$8 sps:$4 sm:$0xff]  }
  0x24   :  { %347 = vmatprep.subr.bf16.mxu1 %v698_v8  ;;  %v721_v23 = vld [vmem:[#allocation2 + $0xe0] ss:$8 sps:$4 sm:$0xff]   ;;  %v722_v24 = vld [vmem:[#allocation2 + $0xd4] ss:$8 sps:$4 sm:$0xff]   ;;  %v724_v25 = vld [vmem:[#allocation2 + $0xd0] ss:$8 sps:$4 sm:$0xff]  }
  0x25   :  { %v725_v26 = vld [vmem:[#allocation2 + $0xc4] ss:$8 sps:$4 sm:$0xff]   ;;  %v727_v27 = vld [vmem:[#allocation2 + $0xc0] ss:$8 sps:$4 sm:$0xff]   ;;  %v728_v28 = vld [vmem:[#allocation2 + $0xb4] ss:$8 sps:$4 sm:$0xff]  }
  0x26   :  { %v730_v29 = vld [vmem:[#allocation2 + $0xb0] ss:$8 sps:$4 sm:$0xff]   ;;  %v731_v30 = vld [vmem:[#allocation2 + $0xa4] ss:$8 sps:$4 sm:$0xff]   ;;  %v733_v31 = vld [vmem:[#allocation2 + $0xa0] ss:$8 sps:$4 sm:$0xff]  }
  0x27   :  { %348 = vmatpush1.bf16.msra.mxu1 %v700_v9  ;;  %v734_v32 = vld [vmem:[#allocation2 + $0x94] ss:$8 sps:$4 sm:$0xff]   ;;  %v736_v33 = vld [vmem:[#allocation2 + $0x90] ss:$8 sps:$4 sm:$0xff]   ;;  %v737_v34 = vld [vmem:[#allocation2 + $0x84] ss:$8 sps:$4 sm:$0xff]  }
  0x28   :  { %349 = vmatprep.subr.bf16.mxu1 %v701_v10  ;;  %v739_v35 = vld [vmem:[#allocation2 + $0x80] ss:$8 sps:$4 sm:$0xff]   ;;  %v740_v36 = vld [vmem:[#allocation4 + $0x78] sm:$0xff]   ;;  %v742_v38 = vld [vmem:[#allocation4 + $0x70] sm:$0xff]   ;;  %v67_v48 = vsub.s32 1, %v62_v47  ;;  %v63_v49 = vsub.s32 0, %v62_v47 }
  0x29   :  { %v741_v37 = vld [vmem:[#allocation4 + $0x38] sm:$0xff]   ;;  %659 = vmatprep.subr.bf16.mxu0 %v740_v36  ;;  %v743_v39 = vld [vmem:[#allocation4 + $0x30] sm:$0xff]   ;;  %v744_v40 = vld [vmem:[#allocation4 + $0x68] sm:$0xff]  }
  0x2a   :  { %660 = vmatpush3.bf16.msra.mxu0 %v741_v37  ;;  %v745_v41 = vld [vmem:[#allocation4 + $0x28] sm:$0xff]   ;;  %v746_v42 = vld [vmem:[#allocation4 + $0x60] sm:$0xff]   ;;  %v748_v44 = vld [vmem:[#allocation4 + $0x58] sm:$0xff]  }
  0x2b   :  { %350 = vmatpush1.bf16.msra.mxu1 %v703_v11  ;;  %661 = vmatprep.subr.bf16.mxu0 %v742_v38  ;;  %v747_v43 = vld [vmem:[#allocation4 + $0x20] sm:$0xff]   ;;  %v749_v45 = vld [vmem:[#allocation4 + $0x18] sm:$0xff]   ;;  %v750_v3 = vld [vmem:[#allocation4 + $0x50] sm:$0xff]  }
  0x2c   :  { %351 = vmatprep.subr.bf16.mxu1 %v704_v12  ;;  %v59_v50 = vld [vmem:[%s882_s2] sm:$0x3]  ;;  %v751_v4 = vld [vmem:[#allocation4 + $0x10] sm:$0xff]   ;;  %v752_v5 = vld [vmem:[#allocation4 + $0x48] sm:$0xff]  }
  0x2d   :  { %v68_v52 = vrot.slane %v59_v50, %v67_v48  ;;  %v64_v53 = vrot.slane %v59_v50, %v63_v49  ;;  %v753_v6 = vld [vmem:[#allocation4 + $0x8] sm:$0xff]   ;;  %v754_v7 = vld [vmem:[#allocation4 + $0x40] sm:$0xff]  }
  0x2e   :  { %662 = vmatpush3.bf16.msra.mxu0 %v743_v39  ;;  %v755_v8 = vld [vmem:[#allocation4] sm:$0xff]  }
  0x2f   :  { %352 = vmatpush1.bf16.msra.mxu1 %v706_v13  ;;  %663 = vmatprep.subr.bf16.mxu0 %v744_v40  ;;  %v171_v9 = vld [vmem:[%s884_s4] sm:$0x3] }
  0x30   :  { %353 = vmatprep.subr.bf16.mxu1 %v707_v14  ;;  %v180_v11 = vrot.slane %v171_v9, %v67_v48  ;;  %v176_v12 = vrot.slane %v171_v9, %v63_v49 }
  0x32   :  { %664 = vmatpush3.bf16.msra.mxu0 %v745_v41  ;;  %v577_v41 = vand.u32 127, %v61_v46 }
  0x33   :  { %354 = vmatpush1.bf16.msra.mxu1 %v709_v15  ;;  %665 = vmatprep.subr.bf16.mxu0 %v746_v42 }
  0x34   :  { %355 = vmatprep.subr.bf16.mxu1 %v710_v16  ;;  %vm578_vm1 = vcmp.ge.s32.totalorder %v577_v41, 8 }
  0x36   :  { %666 = vmatpush3.bf16.msra.mxu0 %v747_v43 }
  0x37   :  { %356 = vmatpush1.bf16.msra.mxu1 %v712_v17  ;;  %667 = vmatprep.subr.bf16.mxu0 %v748_v44 }
  0x38   :  { %357 = vmatprep.subr.bf16.mxu1 %v713_v18 }
  0x3a   :  { %668 = vmatpush3.bf16.msra.mxu0 %v749_v45 }
  0x3b   :  { %358 = vmatpush1.bf16.msra.mxu1 %v715_v19  ;;  %669 = vmatprep.subr.bf16.mxu0 %v750_v3 }
  0x3c   :  { %359 = vmatprep.subr.bf16.mxu1 %v716_v20 }
  0x3e   :  { %670 = vmatpush3.bf16.msra.mxu0 %v751_v4 }
  0x3f   :  { %360 = vmatpush2.bf16.msra.mxu1 %v718_v21  ;;  %671 = vmatprep.subr.bf16.mxu0 %v752_v5 }
  0x40   :  { %361 = vmatprep.subr.bf16.mxu1 %v719_v22 }
  0x42   :  { %672 = vmatpush3.bf16.msra.mxu0 %v753_v6 }
  0x43   :  { %362 = vmatpush2.bf16.msra.mxu1 %v721_v23  ;;  %673 = vmatprep.subr.bf16.mxu0 %v754_v7 }
  0x44   :  { %363 = vmatprep.subr.bf16.mxu1 %v722_v24 }
  0x46   :  { %674 = vmatpush3.bf16.msra.mxu0 %v755_v8 }
  0x47   :  { %364 = vmatpush2.bf16.msra.mxu1 %v724_v25 }
  0x48   :  { %365 = vmatprep.subr.bf16.mxu1 %v725_v26 }
  0x4b   :  { %366 = vmatpush2.bf16.msra.mxu1 %v727_v27  ;;  %v633_v27 = vld [vmem:[%s886_s6] ss:$0 sm:$0xff] }
  0x4c   :  { %367 = vmatprep.subr.bf16.mxu1 %v728_v28 }
  0x4f   :  { %368 = vmatpush2.bf16.msra.mxu1 %v730_v29 }
  0x50   :  { %369 = vmatprep.subr.bf16.mxu1 %v731_v30 }
  0x53   :  { %370 = vmatpush2.bf16.msra.mxu1 %v733_v31 }
  0x54   :  { %371 = vmatprep.subr.bf16.mxu1 %v734_v32 }
  0x57   :  { %372 = vmatpush2.bf16.msra.mxu1 %v736_v33 }
  0x58   :  { %373 = vmatprep.subr.bf16.mxu1 %v737_v34 }
  0x5b   :  { %374 = vmatpush2.bf16.msra.mxu1 %v739_v35 }
  0xe1   :  { %v124_v51 = vpop.f32.mrf.mxu0 }
  0xe2   :  { %v125_v58 = vadd.f32 %v124_v51, %v64_v53 }
  0xe3   :  { %v126_v54 = vpop.f32.mrf.mxu0 }
  0xe4   :  { %v127_v56 = vadd.f32 %v126_v54, %v68_v52  ;;  %v133_v0 = vmax.f32 %v125_v58, 0.0 }
  0xe5   :  { %v128_v55 = vpop.f32.mrf.mxu0 }
  0xe6   :  { %v129_v57 = vadd.f32 %v128_v55, %v64_v53  ;;  %v134_v62 = vmax.f32 %v127_v56, 0.0 }
  0xe7   :  { %v130_v59 = vpop.f32.mrf.mxu0 }
  0xe8   :  { %v131_v60 = vadd.f32 %v130_v59, %v68_v52  ;;  %v135_v61 = vmax.f32 %v129_v57, 0.0 }
  0xea   :  { %v136_v63 = vmax.f32 %v131_v60, 0.0  ;;  %v137_v2 = vpack.c.bf16 %v135_v61, %v133_v0 }
  0xec   :  { %v138_v1 = vpack.c.bf16 %v136_v63, %v134_v62 }
  0xee   :  { %375 = vmatprep.mubr.bf16.mxu1 %v138_v1 }
  0xef   :  { %376 = vmatmul.mubr.bf16.vlgmr.msra.gmra.mxu1 %v137_v2 }
 0x1af   :  { %v377_v10 = vpop.f32.mrf.mxu1 }
 0x1b0   :  { %v378_v17 = vadd.f32 %v377_v10, %v176_v12 }
 0x1b1   :  { %v379_v13 = vpop.f32.mrf.mxu1 }
 0x1b2   :  { %v380_v15 = vadd.f32 %v379_v13, %v180_v11  ;;  %v386_v23 = vmax.f32 %v378_v17, 0.0 }
 0x1b3   :  { %v381_v14 = vpop.f32.mrf.mxu1 }
 0x1b4   :  { %v382_v16 = vadd.f32 %v381_v14, %v176_v12  ;;  %v387_v21 = vmax.f32 %v380_v15, 0.0 }
 0x1b5   :  { %v383_v18 = vpop.f32.mrf.mxu1 }
 0x1b6   :  { %v384_v19 = vadd.f32 %v383_v18, %v180_v11  ;;  %v388_v20 = vmax.f32 %v382_v16, 0.0 }
 0x1b8   :  { %v389_v22 = vmax.f32 %v384_v19, 0.0  ;;  %v390_v25 = vpack.c.bf16 %v388_v20, %v386_v23 }
 0x1ba   :  { %v391_v24 = vpack.c.bf16 %v389_v22, %v387_v21 }
 0x1bc   :  { %559 = vmatprep.mubr.bf16.mxu0 %v391_v24 }
 0x1bd   :  { %560 = vmatmul.mubr.bf16.vlgmr.msra.gmra.mxu0 %v390_v25 }
 0x27d   :  { %v675_v26 = vpop.f32.mrf.mxu0 }
 0x27f   :  { %v676_v28 = vpop.f32.mrf.mxu0 }
 0x280   :  { %v677_v29 = vadd.f32 %v676_v28, %v675_v26 }
 0x281   :  { %v678_v30 = vpop.f32.mrf.mxu0 }
 0x282   :  { %v562_v31 = vadd.f32 %v677_v29, %v633_v27 }
 0x283   :  { %v679_v32 = vpop.f32.mrf.mxu0 }
 0x284   :  { %v568_v33 = vmax.f32 %v562_v31, -5.0  ;;  %v680_v34 = vadd.f32 %v679_v32, %v678_v30 }
 0x286   :  { %v570_v35 = vmin.f32 %v568_v33, 2.0  ;;  %v565_v36 = vadd.f32 %v680_v34, %v633_v27 }
 0x288   :  { %v572_v37 = vmul.f32 1.442695, %v570_v35  ;;  %v569_v38 = vmax.f32 %v565_v36, -5.0 }
 0x28a   :  { %v571_v39 = vmin.f32 %v569_v38, 2.0  ;;  %756 = vpow2.f32 %v572_v37 }
 0x28c   :  { %v574_v40 = vmul.f32 1.442695, %v571_v39 }
 0x28e   :  { %758 = vpow2.f32 %v574_v40 }
 0x297   :  { %v757_v42 = vpop.eup %756 }
 0x298   :  { %v579_v44 = vsel %vm578_vm1, %v757_v42, %v562_v31 }
 0x29b   :  { %v759_v43 = vpop.eup %758 }
 0x29c   :  { %v580_v45 = vsel %vm578_vm1, %v759_v43, %v565_v36 }
 0x29d   :  { %v657_v47 = vpack.c.bf16 %v580_v45, %v579_v44 }
 0x29f   :  { %658 = vst [vmem:[%s887_s7] sm:$0xff] %v657_v47  }
 0x2a0   :  { %595 = vsyncpa [#allocation3], 1 }
 0x2a1   :  { %596 = vsyncpa [#allocation5], 1 }

</bundles_post_ra>
